<compile_context>
chip_gen: v5e
topology: v5e:2x2
jax: 0.10.0
libtpu: 0.0.40
codegen_flags: <defaults>
</compile_context>

<pallas_src>
import jax
import jax.numpy as jnp
import numpy as np
from jax import lax
from jax.experimental import pallas as pl
from jax.experimental.pallas import tpu as pltpu

TAU = 2.0     # LIF membrane time constant
V_TH = 1.0    # LIF firing threshold (spikingjelly default), v_reset = 0 (hard reset)
K = 3         # 3x3 conv, stride 1, padding 1


def _make_convlif_kernel(H, W, b_blk):
    """Kernel factory; H, W, b_blk are compile-time constants."""
    HW = H * W

    def kernel(x_ref, w_ref, shift_ref, colmask_ref, o_ref, v_ref):
        """One grid step = (batch-block b, time t).  grid = (B//b_blk, T), T innermost.

        x_ref:       (b_blk, C_in, L)   bf16  zero-padded flat image, L = H*W + 2W + 2
        w_ref:       (9, C_out, C_in)   bf16  BN-scale-folded weights, tap-major (kh,kw)
        shift_ref:   (C_out, 1)         f32   folded conv bias + BN shift
        colmask_ref: (3, 1, HW)         bf16  0/1 column-validity masks per kw
        o_ref:       (b_blk, C_out, HW) bf16  output spikes (exact 0/1)
        v_ref:       (b_blk, C_out, HW) f32   membrane potential, carried over t
        """
        t = pl.program_id(1)

        # Reset membrane potential at the first time step of each batch block.
        @pl.when(t == 0)
        def _():
            v_ref[...] = jnp.zeros_like(v_ref)

        # Hoist small constant loads out of the tap/batch loops.
        mask_l = colmask_ref[0]                  # (1, HW) valid cols for kw=0 (dw=-1)
        mask_r = colmask_ref[2]                  # (1, HW) valid cols for kw=2 (dw=+1)
        w_taps = [w_ref[i] for i in range(K * K)]  # 9 x (C_out, C_in)
        shift = shift_ref[...]                   # (C_out, 1)

        for bb in range(b_blk):                  # static, small unrolled loop
            xb = x_ref[bb]                       # (C_in, L) bf16, read ONCE from VMEM

            # 3x3 conv as 9 accumulating MXU matmuls over static lane-shifted slices.
            acc = None
            for kh in range(K):
                for kw in range(K):
                    off = (W + 1) + (kh - 1) * W + (kw - 1)   # static halo offset
                    xs = xb[:, off:off + HW]                  # (C_in, HW)
                    if kw == 0:
                        xs = xs * mask_l         # zero wrapped left-border column
                    elif kw == 2:
                        xs = xs * mask_r         # zero wrapped right-border column
                    d = jnp.dot(w_taps[kh * K + kw], xs,
                                preferred_element_type=jnp.float32)
                    acc = d if acc is None else acc + d

            y = acc + shift                      # per-channel (conv bias + BN) shift

            # MultiStepLIF: charge, fire, hard reset (v_reset = 0) via cmp + select.
            v = v_ref[bb]
            v = v + (y - v) * (1.0 / TAU)        # v += (x - v) / tau   (tau = 2 exact)
            spike = v >= V_TH
            v_ref[bb] = jnp.where(spike, 0.0, v)
            o_ref[bb] = spike.astype(o_ref.dtype)   # bf16 spikes (exact 0/1)

    return kernel


def conv_lif_pallas(x_flat, w9, shift_col, colmask, *, H, W, b_blk):
    """x_flat: (T, B, C_in, L) bf16 with L = H*W + 2W + 2; w9: (9, C_out, C_in) bf16;
    shift_col: (C_out, 1) f32; colmask: (3, 1, H*W) bf16.
    Returns spikes (T, B, C_out, H*W) bf16."""
    T, B, C_in, L = x_flat.shape
    KK, C_out, _ = w9.shape
    HW = H * W
    assert L == HW + 2 * W + 2
    assert B % b_blk == 0
    nB = B // b_blk

    # Explicit VMEM budget (double-buffered inputs/outputs + persistent v scratch).
    x_blk = b_blk * C_in * L * 2
    o_blk = b_blk * C_out * HW * 2
    const = KK * C_out * C_in * 2 + C_out * 4 + 3 * HW * 2
    v_scr = b_blk * C_out * HW * 4
    need = 2 * (x_blk + o_blk + const) + v_scr
    vmem_limit = int(min(max(need + (4 << 20), 16 << 20), 64 << 20))

    kernel = _make_convlif_kernel(H, W, b_blk)

    return pl.pallas_call(
        kernel,
        out_shape=jax.ShapeDtypeStruct((T, B, C_out, HW), jnp.bfloat16),
        grid_spec=pltpu.PrefetchScalarGridSpec(
            num_scalar_prefetch=0,
            grid=(nB, T),                        # T inner -> LIF state carries in time
            in_specs=[
                pl.BlockSpec((None, b_blk, C_in, L), lambda b, t: (t, b, 0, 0)),
                pl.BlockSpec((KK, C_out, C_in), lambda b, t: (0, 0, 0)),
                pl.BlockSpec((C_out, 1), lambda b, t: (0, 0)),
                pl.BlockSpec((3, 1, HW), lambda b, t: (0, 0, 0)),
            ],
            out_specs=pl.BlockSpec((None, b_blk, C_out, HW),
                                   lambda b, t: (t, b, 0, 0)),
            scratch_shapes=[pltpu.VMEM((b_blk, C_out, HW), jnp.float32)],  # membrane v
        ),
        compiler_params=pltpu.CompilerParams(
            # Batch blocks are independent -> "parallel" (v7x 2-TC megacore).
            # T must stay sequential ("arbitrary") for the membrane-state carry.
            dimension_semantics=("parallel", "arbitrary"),
            vmem_limit_bytes=vmem_limit),
    )(x_flat, w9, shift_col, colmask)


def fold_conv_bn(w_oihw, bias, gamma, beta, running_mean, running_var, eps):
    """Fold eval-mode BatchNorm into the conv:  y = (w * scale) . x + shift.
    Returns weights as (K*K, C_out, C_in) bf16 (tap-major) and shift (C_out,1) f32."""
    scale = gamma / jnp.sqrt(running_var + eps)               # (C_out,)
    shift = beta + (bias - running_mean) * scale              # (C_out,)
    C_out, C_in, KH, KW = w_oihw.shape
    w9 = jnp.transpose(w_oihw, (2, 3, 0, 1)).reshape(KH * KW, C_out, C_in)
    w9 = w9 * scale.reshape(1, C_out, 1)
    return w9.astype(jnp.bfloat16), shift.reshape(C_out, 1).astype(jnp.float32)


def _flatten_pad_activations(x_tbchw):
    """(T,B,C,H,W) -> (T,B,C, H*W + 2W + 2) bf16: per-image row-major flattening with
    W+1 zeros of halo on each side (covers the +-1 row/column shifts of the 3x3 taps)."""
    T, B, C, H, W = x_tbchw.shape
    xf = x_tbchw.astype(jnp.bfloat16).reshape(T, B, C, H * W)
    return jnp.pad(xf, ((0, 0), (0, 0), (0, 0), (W + 1, W + 1)))


def _column_masks(H, W):
    """0/1 masks (3,1,H*W) zeroing output columns whose kw-shifted read wraps rows."""
    col = np.arange(H * W) % W
    m = np.ones((3, 1, H * W), np.float32)
    m[0, 0, col == 0] = 0.0         # kw=0 (dw=-1): output col 0 reads left padding
    m[2, 0, col == W - 1] = 0.0     # kw=2 (dw=+1): output col W-1 reads right padding
    return jnp.asarray(m, jnp.bfloat16)


def conv_lif_forward(x_tbchw, w_oihw, bias, gamma, beta, running_mean,
                     running_var, eps=1e-5, b_blk=None):
    """ConvLif forward (eval-mode BN).  x: (T,B,C_in,H,W) -> spikes (T,B,C_out,H,W)."""
    T, B, C_in, H, W = x_tbchw.shape
    C_out = w_oihw.shape[0]
    assert w_oihw.shape[2] == K and w_oihw.shape[3] == K
    HW = H * W

    if b_blk is None:
        # Smallest divisor of B giving >= ~512 lanes of work per grid step, while
        # keeping nB >= 2 so v7x's second TensorCore isn't idle.
        b_blk = 1
        while (b_blk * HW < 512 and B % (2 * b_blk) == 0
               and B // (2 * b_blk) >= 2):
            b_blk *= 2
    assert B % b_blk == 0

    w9, shift_col = fold_conv_bn(w_oihw, bias, gamma, beta, running_mean,
                                 running_var, eps)
    x_flat = _flatten_pad_activations(x_tbchw)
    colmask = _column_masks(H, W)
    out = conv_lif_pallas(x_flat, w9, shift_col, colmask, H=H, W=W, b_blk=b_blk)
    return out.reshape(T, B, C_out, H, W)        # bf16 spikes (exact 0/1)


def ref_forward(x_tbchw, w_oihw, bias, gamma, beta, running_mean, running_var,
                eps=1e-5):
    """Pure-JAX reference of the same forward pass (same bf16 operands)."""
    T, B, C_in, H, W = x_tbchw.shape
    C_out = w_oihw.shape[0]
    scale = gamma / jnp.sqrt(running_var + eps)
    shift = beta + (bias - running_mean) * scale
    w_hwio = (jnp.transpose(w_oihw, (2, 3, 1, 0)) * scale).astype(jnp.bfloat16)
    x_nhwc = jnp.transpose(x_tbchw, (0, 1, 3, 4, 2)).astype(jnp.bfloat16)
    xf = x_nhwc.reshape(T * B, H, W, C_in)
    y = lax.conv_general_dilated(
        xf, w_hwio, window_strides=(1, 1), padding=((1, 1), (1, 1)),
        dimension_numbers=("NHWC", "HWIO", "NHWC"),
        preferred_element_type=jnp.float32)
    y = y + shift.reshape(1, 1, 1, -1)
    y = y.reshape(T, B, H, W, C_out)
    v = jnp.zeros_like(y[0])
    outs = []
    for t in range(T):
        v = v + (y[t] - v) * (1.0 / TAU)
        s = (v >= V_TH).astype(jnp.float32)
        v = v * (1.0 - s)
        outs.append(s)
    spikes = jnp.stack(outs)                                  # (T,B,H,W,C_out)
    return jnp.transpose(spikes, (0, 1, 4, 2, 3))             # (T,B,C_out,H,W)


if __name__ == "__main__":
    T, B, C_in, H, W = 4, 2, 4, 16, 16
    C_out = 8

    key = jax.random.PRNGKey(0)
    kx, kw_, kb = jax.random.split(key, 3)

    # Input in the original PyTorch layout (T, B, C, H, W).
    x_tbchw = jax.random.normal(kx, (T, B, C_in, H, W), jnp.float32)

    # Conv2d parameters, PyTorch-style uniform(-1/sqrt(fan_in), 1/sqrt(fan_in)).
    fan_in = C_in * K * K
    bound = 1.0 / np.sqrt(fan_in)
    w_oihw = jax.random.uniform(kw_, (C_out, C_in, K, K), jnp.float32, -bound, bound)
    bias = jax.random.uniform(kb, (C_out,), jnp.float32, -bound, bound)

    # BatchNorm2d deterministic defaults (eval mode).
    gamma = jnp.ones((C_out,), jnp.float32)
    beta = jnp.zeros((C_out,), jnp.float32)
    running_mean = jnp.zeros((C_out,), jnp.float32)
    running_var = jnp.ones((C_out,), jnp.float32)
    eps = 1e-5

    ref = ref_forward(x_tbchw, w_oihw, bias, gamma, beta,
                      running_mean, running_var, eps)

    # Default b_blk (=1 here -> grid (2, T), both megacore TCs busy).
    out = conv_lif_forward(x_tbchw, w_oihw, bias, gamma, beta,
                           running_mean, running_var, eps)
    out = jax.block_until_ready(out)
    assert out.shape == (T, B, C_out, H, W)

    # Spikes are 0/1; allow a tiny mismatch fraction for membrane values that land
    # exactly at threshold under differing f32 accumulation orders.
    mismatch = float(jnp.mean(jnp.abs(out.astype(jnp.float32) - ref)))
    assert mismatch < 5e-3, f"spike mismatch fraction too high: {mismatch}"

    # Also exercise a multi-image batch block (in-kernel bb loop, grid (1, T)).
    out2 = conv_lif_forward(x_tbchw, w_oihw, bias, gamma, beta,
                            running_mean, running_var, eps, b_blk=2)
    out2 = jax.block_until_ready(out2)
    mismatch2 = float(jnp.mean(jnp.abs(out2.astype(jnp.float32) - ref)))
    assert mismatch2 < 5e-3, f"spike mismatch (b_blk=2) too high: {mismatch2}"

    print("KERNEL_OK")
</pallas_src>

<mosaic_0001>
module attributes {stable_mosaic.version = 11 : i64} {
  func.func @kernel(%arg0: i32, %arg1: i32, %arg2: memref<1x1x4x290xbf16, #tpu.memory_space<vmem>>, %arg3: memref<9x8x4xbf16, #tpu.memory_space<vmem>>, %arg4: memref<8x1xf32, #tpu.memory_space<vmem>>, %arg5: memref<3x1x256xbf16, #tpu.memory_space<vmem>>, %arg6: memref<1x1x8x256xbf16, #tpu.memory_space<vmem>>, %arg7: memref<1x8x256xf32, #tpu.memory_space<vmem>>) attributes {dimension_semantics = [#tpu.dimension_semantics<parallel>, #tpu.dimension_semantics<arbitrary>], iteration_bounds = array<i64: 2, 4>, scalar_prefetch = 0 : i64, scratch_operands = 1 : i64, tpu.core_type = #tpu.core_type<tc>, window_params = [{transform_indices = @transform_0, window_bounds = array<i64: 1, 1, 4, 290>}, {pipeline_mode = #tpu.pipeline_mode<synchronous>, transform_indices = @transform_1, window_bounds = array<i64: 9, 8, 4>}, {pipeline_mode = #tpu.pipeline_mode<synchronous>, transform_indices = @transform_2, window_bounds = array<i64: 8, 1>}, {pipeline_mode = #tpu.pipeline_mode<synchronous>, transform_indices = @transform_3, window_bounds = array<i64: 3, 1, 256>}, {transform_indices = @transform_4, window_bounds = array<i64: 1, 1, 8, 256>}]} {
    %c0_i32 = arith.constant 0 : i32
    %0 = arith.cmpi eq, %arg1, %c0_i32 : i32
    %1 = arith.extui %0 : i1 to i32
    %c0_i32_0 = arith.constant 0 : i32
    %2 = arith.cmpi ne, %1, %c0_i32_0 : i32
    scf.if %2 {
      %cst_52 = arith.constant 0.000000e+00 : f32
      %87 = vector.broadcast %cst_52 : f32 to vector<1x8x256xf32>
      %c0_53 = arith.constant 0 : index
      %c0_54 = arith.constant 0 : index
      %c0_55 = arith.constant 0 : index
      %88 = vector.load %arg7[%c0_53, %c0_54, %c0_55] : memref<1x8x256xf32, #tpu.memory_space<vmem>>, vector<1x8x256xf32>
      tpu.vector_store %arg7[%c0_53, %c0_54, %c0_55], %87 {strides = array<i32>} : memref<1x8x256xf32, #tpu.memory_space<vmem>>, vector<1x8x256xf32>,
    } else {
    }
    %c0 = arith.constant 0 : index
    %c0_1 = arith.constant 0 : index
    %c0_2 = arith.constant 0 : index
    %3 = vector.load %arg5[%c0, %c0_1, %c0_2] : memref<3x1x256xbf16, #tpu.memory_space<vmem>>, vector<1x1x256xbf16>
    %4 = vector.shape_cast %3 : vector<1x1x256xbf16> to vector<1x256xbf16>
    %c2 = arith.constant 2 : index
    %c0_3 = arith.constant 0 : index
    %c0_4 = arith.constant 0 : index
    %5 = vector.load %arg5[%c2, %c0_3, %c0_4] : memref<3x1x256xbf16, #tpu.memory_space<vmem>>, vector<1x1x256xbf16>
    %6 = vector.shape_cast %5 : vector<1x1x256xbf16> to vector<1x256xbf16>
    %c0_5 = arith.constant 0 : index
    %c0_6 = arith.constant 0 : index
    %c0_7 = arith.constant 0 : index
    %7 = vector.load %arg3[%c0_5, %c0_6, %c0_7] : memref<9x8x4xbf16, #tpu.memory_space<vmem>>, vector<1x8x4xbf16>
    %8 = vector.shape_cast %7 : vector<1x8x4xbf16> to vector<8x4xbf16>
    %c1 = arith.constant 1 : index
    %c0_8 = arith.constant 0 : index
    %c0_9 = arith.constant 0 : index
    %9 = vector.load %arg3[%c1, %c0_8, %c0_9] : memref<9x8x4xbf16, #tpu.memory_space<vmem>>, vector<1x8x4xbf16>
    %10 = vector.shape_cast %9 : vector<1x8x4xbf16> to vector<8x4xbf16>
    %c2_10 = arith.constant 2 : index
    %c0_11 = arith.constant 0 : index
    %c0_12 = arith.constant 0 : index
    %11 = vector.load %arg3[%c2_10, %c0_11, %c0_12] : memref<9x8x4xbf16, #tpu.memory_space<vmem>>, vector<1x8x4xbf16>
    %12 = vector.shape_cast %11 : vector<1x8x4xbf16> to vector<8x4xbf16>
    %c3 = arith.constant 3 : index
    %c0_13 = arith.constant 0 : index
    %c0_14 = arith.constant 0 : index
    %13 = vector.load %arg3[%c3, %c0_13, %c0_14] : memref<9x8x4xbf16, #tpu.memory_space<vmem>>, vector<1x8x4xbf16>
    %14 = vector.shape_cast %13 : vector<1x8x4xbf16> to vector<8x4xbf16>
    %c4 = arith.constant 4 : index
    %c0_15 = arith.constant 0 : index
    %c0_16 = arith.constant 0 : index
    %15 = vector.load %arg3[%c4, %c0_15, %c0_16] : memref<9x8x4xbf16, #tpu.memory_space<vmem>>, vector<1x8x4xbf16>
    %16 = vector.shape_cast %15 : vector<1x8x4xbf16> to vector<8x4xbf16>
    %c5 = arith.constant 5 : index
    %c0_17 = arith.constant 0 : index
    %c0_18 = arith.constant 0 : index
    %17 = vector.load %arg3[%c5, %c0_17, %c0_18] : memref<9x8x4xbf16, #tpu.memory_space<vmem>>, vector<1x8x4xbf16>
    %18 = vector.shape_cast %17 : vector<1x8x4xbf16> to vector<8x4xbf16>
    %c6 = arith.constant 6 : index
    %c0_19 = arith.constant 0 : index
    %c0_20 = arith.constant 0 : index
    %19 = vector.load %arg3[%c6, %c0_19, %c0_20] : memref<9x8x4xbf16, #tpu.memory_space<vmem>>, vector<1x8x4xbf16>
    %20 = vector.shape_cast %19 : vector<1x8x4xbf16> to vector<8x4xbf16>
    %c7 = arith.constant 7 : index
    %c0_21 = arith.constant 0 : index
    %c0_22 = arith.constant 0 : index
    %21 = vector.load %arg3[%c7, %c0_21, %c0_22] : memref<9x8x4xbf16, #tpu.memory_space<vmem>>, vector<1x8x4xbf16>
    %22 = vector.shape_cast %21 : vector<1x8x4xbf16> to vector<8x4xbf16>
    %c8 = arith.constant 8 : index
    %c0_23 = arith.constant 0 : index
    %c0_24 = arith.constant 0 : index
    %23 = vector.load %arg3[%c8, %c0_23, %c0_24] : memref<9x8x4xbf16, #tpu.memory_space<vmem>>, vector<1x8x4xbf16>
    %24 = vector.shape_cast %23 : vector<1x8x4xbf16> to vector<8x4xbf16>
    %c0_25 = arith.constant 0 : index
    %c0_26 = arith.constant 0 : index
    %25 = vector.load %arg4[%c0_25, %c0_26] : memref<8x1xf32, #tpu.memory_space<vmem>>, vector<8x1xf32>
    %c0_27 = arith.constant 0 : index
    %c0_28 = arith.constant 0 : index
    %c0_29 = arith.constant 0 : index
    %c0_30 = arith.constant 0 : index
    %26 = vector.load %arg2[%c0_27, %c0_28, %c0_29, %c0_30] : memref<1x1x4x290xbf16, #tpu.memory_space<vmem>>, vector<1x1x4x290xbf16>
    %27 = vector.shape_cast %26 : vector<1x1x4x290xbf16> to vector<4x290xbf16>
    %28 = vector.extract_strided_slice %27 {offsets = [0, 0], sizes = [4, 256], strides = [1, 1]} : vector<4x290xbf16> to vector<4x256xbf16>
    %29 = vector.broadcast %4 : vector<1x256xbf16> to vector<4x256xbf16>
    %30 = arith.mulf %28, %29 : vector<4x256xbf16>
    %cst = arith.constant dense<0.000000e+00> : vector<8x256xf32>
    %31 = tpu.matmul %8, %30, %cst {dimension_numbers = #tpu.dot_dimension_numbers<[1], [0], [0], [1], [0, 0, 1, 1], [], []>} : vector<8x4xbf16>, vector<4x256xbf16>, vector<8x256xf32> -> vector<8x256xf32>
    %32 = vector.extract_strided_slice %27 {offsets = [0, 1], sizes = [4, 256], strides = [1, 1]} : vector<4x290xbf16> to vector<4x256xbf16>
    %cst_31 = arith.constant dense<0.000000e+00> : vector<8x256xf32>
    %33 = tpu.matmul %10, %32, %cst_31 {dimension_numbers = #tpu.dot_dimension_numbers<[1], [0], [0], [1], [0, 0, 1, 1], [], []>} : vector<8x4xbf16>, vector<4x256xbf16>, vector<8x256xf32> -> vector<8x256xf32>
    %34 = arith.addf %31, %33 : vector<8x256xf32>
    %35 = vector.extract_strided_slice %27 {offsets = [0, 2], sizes = [4, 256], strides = [1, 1]} : vector<4x290xbf16> to vector<4x256xbf16>
    %36 = vector.broadcast %6 : vector<1x256xbf16> to vector<4x256xbf16>
    %37 = arith.mulf %35, %36 : vector<4x256xbf16>
    %cst_32 = arith.constant dense<0.000000e+00> : vector<8x256xf32>
    %38 = tpu.matmul %12, %37, %cst_32 {dimension_numbers = #tpu.dot_dimension_numbers<[1], [0], [0], [1], [0, 0, 1, 1], [], []>} : vector<8x4xbf16>, vector<4x256xbf16>, vector<8x256xf32> -> vector<8x256xf32>
    %39 = arith.addf %34, %38 : vector<8x256xf32>
    %40 = vector.extract_strided_slice %27 {offsets = [0, 16], sizes = [4, 256], strides = [1, 1]} : vector<4x290xbf16> to vector<4x256xbf16>
    %41 = vector.broadcast %4 : vector<1x256xbf16> to vector<4x256xbf16>
    %42 = arith.mulf %40, %41 : vector<4x256xbf16>
    %cst_33 = arith.constant dense<0.000000e+00> : vector<8x256xf32>
    %43 = tpu.matmul %14, %42, %cst_33 {dimension_numbers = #tpu.dot_dimension_numbers<[1], [0], [0], [1], [0, 0, 1, 1], [], []>} : vector<8x4xbf16>, vector<4x256xbf16>, vector<8x256xf32> -> vector<8x256xf32>
    %44 = arith.addf %39, %43 : vector<8x256xf32>
    %45 = vector.extract_strided_slice %27 {offsets = [0, 17], sizes = [4, 256], strides = [1, 1]} : vector<4x290xbf16> to vector<4x256xbf16>
    %cst_34 = arith.constant dense<0.000000e+00> : vector<8x256xf32>
    %46 = tpu.matmul %16, %45, %cst_34 {dimension_numbers = #tpu.dot_dimension_numbers<[1], [0], [0], [1], [0, 0, 1, 1], [], []>} : vector<8x4xbf16>, vector<4x256xbf16>, vector<8x256xf32> -> vector<8x256xf32>
    %47 = arith.addf %44, %46 : vector<8x256xf32>
    %48 = vector.extract_strided_slice %27 {offsets = [0, 18], sizes = [4, 256], strides = [1, 1]} : vector<4x290xbf16> to vector<4x256xbf16>
    %49 = vector.broadcast %6 : vector<1x256xbf16> to vector<4x256xbf16>
    %50 = arith.mulf %48, %49 : vector<4x256xbf16>
    %cst_35 = arith.constant dense<0.000000e+00> : vector<8x256xf32>
    %51 = tpu.matmul %18, %50, %cst_35 {dimension_numbers = #tpu.dot_dimension_numbers<[1], [0], [0], [1], [0, 0, 1, 1], [], []>} : vector<8x4xbf16>, vector<4x256xbf16>, vector<8x256xf32> -> vector<8x256xf32>
    %52 = arith.addf %47, %51 : vector<8x256xf32>
    %53 = vector.extract_strided_slice %27 {offsets = [0, 32], sizes = [4, 256], strides = [1, 1]} : vector<4x290xbf16> to vector<4x256xbf16>
    %54 = vector.broadcast %4 : vector<1x256xbf16> to vector<4x256xbf16>
    %55 = arith.mulf %53, %54 : vector<4x256xbf16>
    %cst_36 = arith.constant dense<0.000000e+00> : vector<8x256xf32>
    %56 = tpu.matmul %20, %55, %cst_36 {dimension_numbers = #tpu.dot_dimension_numbers<[1], [0], [0], [1], [0, 0, 1, 1], [], []>} : vector<8x4xbf16>, vector<4x256xbf16>, vector<8x256xf32> -> vector<8x256xf32>
    %57 = arith.addf %52, %56 : vector<8x256xf32>
    %58 = vector.extract_strided_slice %27 {offsets = [0, 33], sizes = [4, 256], strides = [1, 1]} : vector<4x290xbf16> to vector<4x256xbf16>
    %cst_37 = arith.constant dense<0.000000e+00> : vector<8x256xf32>
    %59 = tpu.matmul %22, %58, %cst_37 {dimension_numbers = #tpu.dot_dimension_numbers<[1], [0], [0], [1], [0, 0, 1, 1], [], []>} : vector<8x4xbf16>, vector<4x256xbf16>, vector<8x256xf32> -> vector<8x256xf32>
    %60 = arith.addf %57, %59 : vector<8x256xf32>
    %61 = vector.extract_strided_slice %27 {offsets = [0, 34], sizes = [4, 256], strides = [1, 1]} : vector<4x290xbf16> to vector<4x256xbf16>
    %62 = vector.broadcast %6 : vector<1x256xbf16> to vector<4x256xbf16>
    %63 = arith.mulf %61, %62 : vector<4x256xbf16>
    %cst_38 = arith.constant dense<0.000000e+00> : vector<8x256xf32>
    %64 = tpu.matmul %24, %63, %cst_38 {dimension_numbers = #tpu.dot_dimension_numbers<[1], [0], [0], [1], [0, 0, 1, 1], [], []>} : vector<8x4xbf16>, vector<4x256xbf16>, vector<8x256xf32> -> vector<8x256xf32>
    %65 = arith.addf %60, %64 : vector<8x256xf32>
    %66 = vector.broadcast %25 : vector<8x1xf32> to vector<8x256xf32>
    %67 = arith.addf %65, %66 : vector<8x256xf32>
    %c0_39 = arith.constant 0 : index
    %c0_40 = arith.constant 0 : index
    %c0_41 = arith.constant 0 : index
    %68 = vector.load %arg7[%c0_39, %c0_40, %c0_41] : memref<1x8x256xf32, #tpu.memory_space<vmem>>, vector<1x8x256xf32>
    %69 = vector.shape_cast %68 : vector<1x8x256xf32> to vector<8x256xf32>
    %70 = arith.subf %67, %69 : vector<8x256xf32>
    %cst_42 = arith.constant 5.000000e-01 : f32
    %71 = vector.broadcast %cst_42 : f32 to vector<8x256xf32>
    %72 = arith.mulf %70, %71 : vector<8x256xf32>
    %73 = arith.addf %69, %72 : vector<8x256xf32>
    %cst_43 = arith.constant 1.000000e+00 : f32
    %74 = vector.broadcast %cst_43 : f32 to vector<8x256xf32>
    %75 = arith.cmpf oge, %73, %74 : vector<8x256xf32>
    %cst_44 = arith.constant 0.000000e+00 : f32
    %76 = vector.broadcast %cst_44 : f32 to vector<8x256xf32>
    %77 = arith.select %75, %76, %73 : vector<8x256xi1>, vector<8x256xf32>
    %c0_45 = arith.constant 0 : index
    %c0_46 = arith.constant 0 : index
    %c0_47 = arith.constant 0 : index
    %78 = vector.load %arg7[%c0_45, %c0_46, %c0_47] : memref<1x8x256xf32, #tpu.memory_space<vmem>>, vector<1x8x256xf32>
    %79 = vector.shape_cast %78 : vector<1x8x256xf32> to vector<8x256xf32>
    %80 = vector.shape_cast %77 : vector<8x256xf32> to vector<1x8x256xf32>
    tpu.vector_store %arg7[%c0_45, %c0_46, %c0_47], %80 {strides = array<i32>} : memref<1x8x256xf32, #tpu.memory_space<vmem>>, vector<1x8x256xf32>,
    %81 = arith.extui %75 : vector<8x256xi1> to vector<8x256xi32>
    %82 = arith.sitofp %81 : vector<8x256xi32> to vector<8x256xf32>
    %83 = arith.truncf %82 : vector<8x256xf32> to vector<8x256xbf16>
    %c0_48 = arith.constant 0 : index
    %c0_49 = arith.constant 0 : index
    %c0_50 = arith.constant 0 : index
    %c0_51 = arith.constant 0 : index
    %84 = vector.load %arg6[%c0_48, %c0_49, %c0_50, %c0_51] : memref<1x1x8x256xbf16, #tpu.memory_space<vmem>>, vector<1x1x8x256xbf16>
    %85 = vector.shape_cast %84 : vector<1x1x8x256xbf16> to vector<8x256xbf16>
    %86 = vector.shape_cast %83 : vector<8x256xbf16> to vector<1x1x8x256xbf16>
    tpu.vector_store %arg6[%c0_48, %c0_49, %c0_50, %c0_51], %86 {strides = array<i32>} : memref<1x1x8x256xbf16, #tpu.memory_space<vmem>>, vector<1x1x8x256xbf16>,
    return
  }
  func.func @transform_0(%arg0: i32, %arg1: i32) -> (i32, i32, i32, i32) {
    %c0_i32 = arith.constant 0 : i32
    %c0_i32_0 = arith.constant 0 : i32
    %c0_i32_1 = arith.constant 0 : i32
    return %arg1, %arg0, %c0_i32, %c0_i32_0 : i32, i32, i32, i32
  }
  func.func @transform_1(%arg0: i32, %arg1: i32) -> (i32, i32, i32) {
    %c0_i32 = arith.constant 0 : i32
    %c0_i32_0 = arith.constant 0 : i32
    %c0_i32_1 = arith.constant 0 : i32
    %c0_i32_2 = arith.constant 0 : i32
    return %c0_i32, %c0_i32_0, %c0_i32_1 : i32, i32, i32
  }
  func.func @transform_2(%arg0: i32, %arg1: i32) -> (i32, i32) {
    %c0_i32 = arith.constant 0 : i32
    %c0_i32_0 = arith.constant 0 : i32
    %c0_i32_1 = arith.constant 0 : i32
    return %c0_i32, %c0_i32_0 : i32, i32
  }
  func.func @transform_3(%arg0: i32, %arg1: i32) -> (i32, i32, i32) {
    %c0_i32 = arith.constant 0 : i32
    %c0_i32_0 = arith.constant 0 : i32
    %c0_i32_1 = arith.constant 0 : i32
    %c0_i32_2 = arith.constant 0 : i32
    return %c0_i32, %c0_i32_0, %c0_i32_1 : i32, i32, i32
  }
  func.func @transform_4(%arg0: i32, %arg1: i32) -> (i32, i32, i32, i32) {
    %c0_i32 = arith.constant 0 : i32
    %c0_i32_0 = arith.constant 0 : i32
    %c0_i32_1 = arith.constant 0 : i32
    return %arg1, %arg0, %c0_i32, %c0_i32_0 : i32, i32, i32, i32
  }
}

</mosaic_0001>

<bundles_post_ra>
// kernel: tpu_custom_call.1
= control target key start
LH: loop header
LB: loop body
LE: loop exit
PB: predicated region body
PF: predicated region fallthrough
CT: control target
= control target key end

     0   :  { %9 = vsyncpa [#allocation4], 0  ;;  %s1493_s0 = inlined_call_operand.vmem [shape: bf16[4,2,4,290], index: 0, kind: input, shape index: {}]   ;;  %s1494_s1 = inlined_call_operand.vmem [shape: bf16[9,8,4], index: 1, kind: input, shape index: {}]   ;;  %s1495_s2 = inlined_call_operand.vmem [shape: f32[8,1], index: 2, kind: input, shape index: {}]   ;;  %s1496_s3 = inlined_call_operand.vmem [shape: bf16[3,1,256], index: 3, kind: input, shape index: {}]   ;;  %s1497_s4 = inlined_call_operand.hbm [shape: bf16[4,2,8,256], index: 4, kind: output, shape index: {}]  }
   0x1   :  { %11 = vsyncpa [#allocation4 + $0x1], 0  ;;  %s1252_s15 = smov 0   ;;  %s1254_s16 = smov 0  }
   0x2   :  { %s1256_s17 = smov 0   ;;  %s1258_s18 = smov 0  }
   0x3   :  { %s1260_s19 = smov 0   ;;  %s1262_s20 = smov 0  }
   0x4   :  { %s1264_s21 = smov 0   ;;  %s1266_s22 = smov 0  }
   0x5 LB: > { %s981_s23 = sadd.s32 4294967295, %s1209_s22   ;;  %s982_s24 = sadd.s32 4294967294, %s1209_s22   ;;  %s1209_s22 = sphi %s1266_s22, %s17_s22   ;;  %s1205_s21 = sphi %s1264_s21, %s1508_s21   ;;  %s1201_s20 = sphi %s1262_s20, %s1507_s20   ;;  %s1197_s19 = sphi %s1260_s19, %s1506_s19   ;;  %s1193_s18 = sphi %s1258_s18, %s1505_s18   ;;  %s1189_s17 = sphi %s1256_s17, %s1504_s17   ;;  %s1185_s16 = sphi %s1254_s16, %s1503_s16   ;;  %s1181_s15 = sphi %s1252_s15, %s1502_s15  }
   0x6   : > { %s26_s25 = sadd.s32 1, %s1201_s20  ;;  %s29_s26 = sadd.s32 1, %s1205_s21 }
   0x7   : > { %p27_p0 = scmp.ge.s32.totalorder %s26_s25, 4  ;;  %p139_p1 = scmp.ne.s32.totalorder %s1189_s17, %s1185_s16 }
   0x8   : > { %p140_p2 = scmp.eq.s32.totalorder %s981_s23, 7  ;;  %p145_p5 = scmp.ne.s32.totalorder %s1185_s16, %s1181_s15 }
   0x9   : > { %s1510_s25 = smov (%p27_p0, %s26_s25), 0  ;;  %s1512_s26 = smov (!%p27_p0, %s29_s26), %s1205_s21 }
   0xa   : > { %s124_s27 = ssub.s32 %s1201_s20, %s1510_s25  ;;  %p1303_p3 = por %p140_p2, %p139_p1 }
   0xb   : > { %p31_p4 = scmp.ge.s32.totalorder %s1512_s26, 2  ;;  %p146_p6 = scmp.eq.s32.totalorder %s982_s24, 7 }
   0xc   : > { %p985_p7 = scmp.ge.s32.totalorder %s1209_s22, 1  ;;  %p185_p9 = scmp.lt.s32.totalorder %s1209_s22, 9 }
   0xd   : > { %s1514_s26 = smov (%p31_p4, %s1512_s26), 0  ;;  %p1312_p8 = por %p146_p6, %p145_p5 }
   0xe   : > { %s125_s30 = ssub.s32 %s1205_s21, %s1514_s26  ;;  %s129_s5 = sadd.s32 1, %s1189_s17 }
   0xf   : > { %s126_s6 = sor.u32 %s125_s30, %s124_s27  ;;  %p186_p10 = pnand %p985_p7, %p185_p9 }
  0x10   : > { %p127_p11 = scmp.eq.s32.totalorder %s126_s6, 0  ;;  %s1498_s8 = sand.u32 (!%p186_p10), 1, %s1185_s16  }
  0x11   : > { %189 = sbr.rel (%p186_p10) target bundleno = 533 (0x215), region = 36  ;;  %p215_p12 = scmp.lt.s32.totalorder (!%p186_p10), %s1193_s18, 3 }
  0x12   : > { %s1321_s7 = scalar_select %p127_p11, %s1189_s17, %s129_s5  }
  0x13   : > { %s1327_s9 = sshll.u32 (!%p186_p10), %s1498_s8, 3  ;;  %p217_p13 = scmp.lt.s32.totalorder (!%p186_p10), %s1197_s19, 1 }
  0x14   : > { %s214_s5 = scalar_lea.vmem (!%p186_p10), [#allocation3], %s1327_s9  ;;  %p988_p0 = scmp.ne.s32.totalorder (!%p186_p10), %s1193_s18, 0 }
  0x16   : > { %s216_s10 = scalar_select %p215_p12, %s1193_s18, 3 }
  0x17   : > { %s218_s11 = scalar_select %p217_p13, %s1197_s19, 1 }
  0x18   : > { %s1025_s12 = smul.u32 6, %s216_s10 }
  0x19   : > { %s1024_s13 = smul.u32 3, %s218_s11 }
  0x1a   : > { %228 = sbr.rel (%p988_p0) target bundleno = 34 (0x22), region = 40 }
  0x1b   : > { %s221_s14 = sadd.s32 %s1025_s12, %s1024_s13 }
  0x1c   : > { %s987_s23 = sshll.u32 %s221_s14, 1 }
  0x1d   : > { %s223_s30 = scalar_lea.vmem %s1493_s0, %s987_s23 }
  0x1f   : > { %v1211_v0 = vmov 0.0  }
  0x20   : > { %229 = vst [vmem:[#allocation2] sm:$0xff] %v1211_v0 }
  0x21   : > { %230 = vst [vmem:[#allocation2 + $0x8] sm:$0xff] %v1211_v0 }
  0x22 PF: > { %v231_v1 = vld [vmem:[%s1496_s3] sm:$0x3]  ;;  %vm269_vm0 = vcmask 1043456   ;;  %v989_v17 = vld [vmem:[%s1496_s3 + $0x4] sm:$0x3]  ;;  %s1212_s11 = smov 127  }
  0x23   : > { %254 = vst [vmem:[#allocation1] ss:$9 sm:$0xff] %v231_v1  ;;  %v1340_v6 = vld [vmem:[%s223_s30] sm:$0x3f]  ;;  %s1213_s12 = smov 2   ;;  %s1214_s13 = smov 18  }
  0x24   : > { %v1343_v11 = vunpack.c.l.bf16 %v1340_v6  ;;  %s1215_s14 = smov 16   ;;  %s1216_s23 = smov 32   ;;  %v1357_v31 = vunpack.c.h.bf16 %v1340_v6  ;;  %vm390_vm1 = vcmask 15360   ;;  %vm462_vm2 = vcmask 130048  }
  0x25   : > { %s1217_s24 = smov 34   ;;  %s1218_s27 = smov 126   ;;  %vm587_vm3 = vcmask 146432   ;;  %vm659_vm4 = vcmask 261120   ;;  %vm784_vm5 = vcmask 277504   ;;  %vm295_vm6 = vcmask 1039360  }
  0x26   : > { %s1219_s30 = smov 112   ;;  %s1220_s6 = smov 111   ;;  %vm302_vm7 = vcmask 1041408   ;;  %vm298_vm8 = vcmask 31744   ;;  %vm419_vm9 = vcmask 1031168   ;;  %vm491_vm10 = vcmask 916480  }
  0x27   : > { %s1221_s8 = smov 110   ;;  %s1222_s10 = smov 96   ;;  %vm544_vm11 = vcmask 908288   ;;  %vm616_vm12 = vcmask 900096   ;;  %vm688_vm13 = vcmask 785408   ;;  %vm741_vm14 = vcmask 777216  }
  0x28   : > { %vm813_vm15 = vcmask 769024  }
  0x2a   : > { %v255_v2 = vld [vmem:[#allocation1] sm:$0xff]  ;;  %v256_v3 = vld [vmem:[#allocation1 + $0x9] sm:$0xff] }
  0x2b   : > { %v257_v4 = vpack.i.b16 %v255_v2, %v255_v2  ;;  %v260_v5 = vpack.i.b16 %v256_v3, %v256_v3 }
  0x2d   : > { %v259_v7 = vperm.slane %v257_v4, 0  ;;  %v262_v8 = vperm.slane %v260_v5, 0 }
  0x2f   : > { %v264_v9 = vunpack.c.l.bf16 %v259_v7  ;;  %v265_v10 = vunpack.c.l.bf16 %v262_v8 }
  0x31   : > { %v268_v12 = vrot.slane %v265_v10, 4 }
  0x33   : > { %v270_v13 = vsel %vm269_vm0, %v264_v9, %v268_v12 }
  0x34   : > { %v272_v14 = vmul.f32 %v270_v13, %v1343_v11 }
  0x36   : > { %274 = vst [vmem:[#allocation1] ss:$2 sm:$0xff] %v272_v14 }
  0x3d   : > { %v1347_v15 = vld.sshfl [vmem:[#allocation1] sm:$0xff pattern:$0x75316420]  ;;  %v1349_v16 = vld.sshfl [vmem:[#allocation1 + $0x8] sm:$0xff pattern:$0x75316420] }
  0x3e   : > { %282 = vst [vmem:[#allocation1] ss:$4 sm:$0xff] %v1340_v6 }
  0x45   : > { %v283_v18 = vld.sshfl [vmem:[#allocation1] sm:$0xff pattern:$0x73625140]  ;;  %v285_v19 = vld.sshfl [vmem:[#allocation1 + $0x8] sm:$0xff pattern:$0x73625140] }
  0x46   : > { %v287_v20 = vld.sshfl [vmem:[#allocation1 + $0x10] sm:$0xff pattern:$0x73625140]  ;;  %289 = vrot.lane.b32.xlu2 %v283_v18, %s1212_s11 }
  0x47   : > { %371 = vst [vmem:[#allocation1] ss:$9 sm:$0xff] %v989_v17 }
  0x4e   : > { %v372_v21 = vld [vmem:[#allocation1] sm:$0xff]  ;;  %v373_v22 = vld [vmem:[#allocation1 + $0x9] sm:$0xff]  ;;  %291 = vrot.lane.b32.xlu2 %v285_v19, %s1212_s11 }
  0x4f   : > { %v374_v23 = vpack.i.b16 %v372_v21, %v372_v21  ;;  %v377_v24 = vpack.i.b16 %v373_v22, %v373_v22 }
  0x51   : > { %v376_v25 = vperm.slane %v374_v23, 0  ;;  %v379_v26 = vperm.slane %v377_v24, 0 }
  0x53   : > { %v381_v27 = vunpack.c.l.bf16 %v376_v25  ;;  %v382_v28 = vunpack.c.l.bf16 %v379_v26 }
  0x55   : > { %v385_v29 = vrot.slane %v382_v28, 4 }
  0x57   : > { %v386_v30 = vsel %vm269_vm0, %v381_v27, %v385_v29 }
  0x58   : > { %387 = vrot.lane.b32.xlu0 %v386_v30, %s1213_s12  ;;  %584 = vrot.lane.b32.xlu1 %v386_v30, %s1214_s13  ;;  %s1224_s12 = smov 94  }
  0x60   : > { %459 = vrot.lane.b32.xlu0 %v270_v13, %s1215_s14  ;;  %656 = vrot.lane.b32.xlu1 %v270_v13, %s1216_s23 }
  0x68   : > { %781 = vrot.lane.b32.xlu1 %v386_v30, %s1217_s24  ;;  %293 = vrot.lane.b32.xlu0 %v287_v20, %s1212_s11  ;;  %s1223_s11 = smov 95   ;;  %s1448_s24 = sshll.u32 %s214_s5, 4  ;;  %s897_s24 = int_to_ptr.vmem [resolvable:$true] %s1448_s24 }
  0xca   : > { %v388_v32 = vpop.permute.xlu0 %387  ;;  %v585_v48 = vpop.permute.xlu1 %584 }
  0xcb   : > { %v389_v33 = vrot.slane %v388_v32, 4  ;;  %v586_v53 = vrot.slane %v585_v48, 4 }
  0xcd   : > { %v391_v34 = vsel %vm390_vm1, %v389_v33, %v388_v32  ;;  %v395_v35 = vmul.f32 %v389_v33, %v1357_v31  ;;  %v588_v56 = vsel %vm587_vm3, %v586_v53, %v585_v48  ;;  %v592_v57 = vmul.f32 %v586_v53, %v1357_v31 }
  0xce   : > { %v394_v36 = vmul.f32 %v391_v34, %v1343_v11  ;;  %v591_v59 = vmul.f32 %v588_v56, %v1343_v11 }
  0xcf   : > { %400 = vst [vmem:[#allocation1 + $0x10] ss:$2 sm:$0xff] %v395_v35 }
  0xd0   : > { %398 = vst [vmem:[#allocation1] ss:$2 sm:$0xff] %v394_v36 }
  0xd2   : > { %v460_v37 = vpop.permute.xlu0 %459  ;;  %v657_v58 = vpop.permute.xlu1 %656 }
  0xd3   : > { %v461_v38 = vrot.slane %v460_v37, 4  ;;  %v658_v63 = vrot.slane %v657_v58, 4 }
  0xd5   : > { %v463_v39 = vsel %vm462_vm2, %v461_v38, %v460_v37  ;;  %v467_v40 = vmul.f32 %v461_v38, %v1357_v31  ;;  %v664_v0 = vmul.f32 %v658_v63, %v1357_v31  ;;  %v660_v1 = vsel %vm659_vm4, %v658_v63, %v657_v58  ;;  %v992_v58 = vld [vmem:[%s1494_s1 + $0xc] sm:$0xf] }
  0xd6   : > { %v466_v41 = vmul.f32 %v463_v39, %v1343_v11  ;;  %v403_v42 = vld.sshfl [vmem:[#allocation1 + $0x10] sm:$0xff pattern:$0x75316420]  ;;  %v663_v3 = vmul.f32 %v660_v1, %v1343_v11  ;;  %v279_v38 = vpack.c.bf16 %v1347_v15, %v1347_v15  ;;  %v280_v39 = vpack.c.bf16 %v1349_v16, %v1349_v16  ;;  %v234_v15 = vld [vmem:[%s1494_s1] sm:$0xf] }
  0xd7   : > { %v409_v43 = vpack.c.bf16 %v403_v42, %v403_v42  ;;  %472 = vst [vmem:[#allocation1 + $0x10] ss:$2 sm:$0xff] %v467_v40  ;;  %v402_v44 = vld.sshfl [vmem:[#allocation1 + $0x8] sm:$0xff pattern:$0x75316420] }
  0xd8   : > { %v408_v45 = vpack.c.bf16 %v402_v44, %v402_v44  ;;  %v401_v46 = vld.sshfl [vmem:[#allocation1] sm:$0xff pattern:$0x75316420]  ;;  %v339_v40 = vsel %vm302_vm7, %v279_v38, 0  ;;  %v993_v1 = vld [vmem:[%s1494_s1 + $0x10] sm:$0xf] }
  0xd9   : > { %417 = vrot.lane.b32.xlu1 %v409_v43, %s1218_s27  ;;  %v407_v47 = vpack.c.bf16 %v401_v46, %v401_v46  ;;  %470 = vst [vmem:[#allocation1] ss:$2 sm:$0xff] %v466_v41  ;;  %v342_v41 = vsel %vm302_vm7, %v280_v39, 0  ;;  %v990_v42 = vld [vmem:[%s1494_s1 + $0x4] sm:$0xf]  ;;  %351 = vmatpush.bf16.msra.mxu2 %v339_v40 }
  0xda   : > { %415 = vrot.lane.b32.xlu0 %v408_v45, %s1218_s27  ;;  %v782_v10 = vpop.permute.xlu1 %781  ;;  %v294_v33 = vpop.permute.xlu0 %293  ;;  %364 = vmatpush.bf16.msra.mxu3 %v342_v41 }
  0xdb   : > { %413 = vrot.lane.b32.xlu2 %v407_v47, %s1218_s27  ;;  %v783_v18 = vrot.slane %v782_v10, 4 }
  0xdc   : > { %1000 = vmatmul.msk.bf16.vlgmr.msra.gmra.mxu2 %vm298_vm8, %v234_v15 }
  0xdd   : > { %v785_v21 = vsel %vm784_vm5, %v783_v18, %v782_v10  ;;  %v789_v22 = vmul.f32 %v783_v18, %v1357_v31  ;;  %1001 = vmatmul.msk.bf16.vlgmr.msra.gmra.mxu3 %vm298_vm8, %v234_v15 }
  0xde   : > { %v475_v49 = vld.sshfl [vmem:[#allocation1 + $0x10] sm:$0xff pattern:$0x75316420]  ;;  %v788_v23 = vmul.f32 %v785_v21, %v1343_v11  ;;  %v290_v11 = vpop.permute.xlu2 %289 }
  0xdf   : > { %v481_v50 = vpack.c.bf16 %v475_v49, %v475_v49 }
  0xe0   : > { %v474_v51 = vld.sshfl [vmem:[#allocation1 + $0x8] sm:$0xff pattern:$0x75316420]  ;;  %v473_v52 = vld.sshfl [vmem:[#allocation1] sm:$0xff pattern:$0x75316420] }
  0xe1   : > { %489 = vrot.lane.b32.xlu1 %v481_v50, %s1219_s30  ;;  %v480_v54 = vpack.c.bf16 %v474_v51, %v474_v51  ;;  %v479_v55 = vpack.c.bf16 %v473_v52, %v473_v52  ;;  %531 = vst [vmem:[#allocation1] ss:$4 sm:$0xff] %v1340_v6  ;;  %v991_v50 = vld [vmem:[%s1494_s1 + $0x8] sm:$0xf] }
  0xe3   : > { %487 = vrot.lane.b32.xlu0 %v480_v54, %s1219_s30  ;;  %485 = vrot.lane.b32.xlu2 %v479_v55, %s1219_s30  ;;  %s1501_s30 = sand.u32 1, %s1185_s16  }
  0xe6   : > { %v292_v31 = vpop.permute.xlu2 %291 }
  0xe7   : > { %v296_v34 = vsel %vm295_vm6, %v290_v11, %v292_v31  ;;  %v297_v35 = vsel %vm295_vm6, %v292_v31, %v294_v33 }
  0xe8   : > { %v536_v60 = vld.sshfl [vmem:[#allocation1 + $0x10] sm:$0xff pattern:$0x73625140]  ;;  %v534_v61 = vld.sshfl [vmem:[#allocation1 + $0x8] sm:$0xff pattern:$0x73625140] }
  0xe9   : > { %542 = vrot.lane.b32.xlu1 %v536_v60, %s1220_s6  ;;  %597 = vst [vmem:[#allocation1 + $0x10] ss:$2 sm:$0xff] %v592_v57  ;;  %v532_v62 = vld.sshfl [vmem:[#allocation1] sm:$0xff pattern:$0x73625140]  ;;  %v304_v36 = vsel %vm302_vm7, %v296_v34, 0 }
  0xea   : > { %595 = vst [vmem:[#allocation1] ss:$2 sm:$0xff] %v591_v59  ;;  %v307_v37 = vsel %vm302_vm7, %v297_v35, 0  ;;  %316 = vmatpush.bf16.msra.mxu0 %v304_v36 }
  0xeb   : > { %540 = vrot.lane.b32.xlu0 %v534_v61, %s1220_s6  ;;  %538 = vrot.lane.b32.xlu2 %v532_v62, %s1220_s6  ;;  %s881_s6 = scalar_lea.sflag [#allocation4], %s1501_s30 }
  0xec   : > { %329 = vmatpush.bf16.msra.mxu1 %v307_v37  ;;  %v997_v37 = vld [vmem:[%s1494_s1 + $0x20] sm:$0xf] }
  0xed   : > { %998 = vmatmul.msk.bf16.vlgmr.msra.gmra.mxu0 %vm298_vm8, %v990_v42 }
  0xef   : > { %999 = vmatmul.msk.bf16.vlgmr.msra.gmra.mxu1 %vm298_vm8, %v990_v42 }
  0xf0   : > { %v600_v2 = vld.sshfl [vmem:[#allocation1 + $0x10] sm:$0xff pattern:$0x75316420] }
  0xf1   : > { %v606_v4 = vpack.c.bf16 %v600_v2, %v600_v2  ;;  %669 = vst [vmem:[#allocation1 + $0x10] ss:$2 sm:$0xff] %v664_v0  ;;  %v599_v5 = vld.sshfl [vmem:[#allocation1 + $0x8] sm:$0xff pattern:$0x75316420] }
  0xf2   : > { %v605_v7 = vpack.c.bf16 %v599_v5, %v599_v5  ;;  %v598_v8 = vld.sshfl [vmem:[#allocation1] sm:$0xff pattern:$0x75316420] }
  0xf3   : > { %614 = vrot.lane.b32.xlu1 %v606_v4, %s1221_s8  ;;  %v604_v9 = vpack.c.bf16 %v598_v8, %v598_v8  ;;  %667 = vst [vmem:[#allocation1] ss:$2 sm:$0xff] %v663_v3  ;;  %v251_v5 = vld [vmem:[%s1495_s2] sm:$0xff] }
  0xf4   : > { %612 = vrot.lane.b32.xlu0 %v605_v7, %s1221_s8 }
  0xf5   : > { %610 = vrot.lane.b32.xlu2 %v604_v9, %s1221_s8  ;;  %v1225_v9 = vmov 0  }
  0xf6   : > { %1113 = vset.pattern.permute.xlu2 %v1225_v9  ;;  %1114 = vset.pattern.permute.xlu0 %v1225_v9 }
  0xf8   : > { %v672_v12 = vld.sshfl [vmem:[#allocation1 + $0x10] sm:$0xff pattern:$0x75316420] }
  0xf9   : > { %v678_v13 = vpack.c.bf16 %v672_v12, %v672_v12 }
  0xfa   : > { %v671_v14 = vld.sshfl [vmem:[#allocation1 + $0x8] sm:$0xff pattern:$0x75316420]  ;;  %v670_v17 = vld.sshfl [vmem:[#allocation1] sm:$0xff pattern:$0x75316420] }
  0xfb   : > { %686 = vrot.lane.b32.xlu1 %v678_v13, %s1222_s10  ;;  %v677_v19 = vpack.c.bf16 %v671_v14, %v671_v14  ;;  %v676_v20 = vpack.c.bf16 %v670_v17, %v670_v17  ;;  %728 = vst [vmem:[#allocation1] ss:$4 sm:$0xff] %v1340_v6  ;;  %v994_v13 = vld [vmem:[%s1494_s1 + $0x14] sm:$0xf] }
  0xfd   : > { %684 = vrot.lane.b32.xlu0 %v677_v19, %s1222_s10  ;;  %682 = vrot.lane.b32.xlu2 %v676_v20, %s1222_s10 }
 0x102   : > { %v733_v24 = vld.sshfl [vmem:[#allocation1 + $0x10] sm:$0xff pattern:$0x73625140]  ;;  %v731_v25 = vld.sshfl [vmem:[#allocation1 + $0x8] sm:$0xff pattern:$0x73625140] }
 0x103   : > { %739 = vrot.lane.b32.xlu1 %v733_v24, %s1223_s11  ;;  %794 = vst [vmem:[#allocation1 + $0x10] ss:$2 sm:$0xff] %v789_v22  ;;  %v729_v26 = vld.sshfl [vmem:[#allocation1] sm:$0xff pattern:$0x73625140] }
 0x104   : > { %792 = vst [vmem:[#allocation1] ss:$2 sm:$0xff] %v788_v23  ;;  %v995_v23 = vld [vmem:[%s1494_s1 + $0x18] sm:$0xf] }
 0x105   : > { %737 = vrot.lane.b32.xlu0 %v731_v25, %s1223_s11  ;;  %735 = vrot.lane.b32.xlu2 %v729_v26, %s1223_s11  ;;  %s1019_s11 = sshll.u32 %s1197_s19, 1 }
 0x10a   : > { %v797_v27 = vld.sshfl [vmem:[#allocation1 + $0x10] sm:$0xff pattern:$0x75316420] }
 0x10b   : > { %v803_v28 = vpack.c.bf16 %v797_v27, %v797_v27  ;;  %v796_v6 = vld.sshfl [vmem:[#allocation1 + $0x8] sm:$0xff pattern:$0x75316420]  ;;  %v795_v29 = vld.sshfl [vmem:[#allocation1] sm:$0xff pattern:$0x75316420] }
 0x10c   : > { %v802_v30 = vpack.c.bf16 %v796_v6, %v796_v6  ;;  %v801_v32 = vpack.c.bf16 %v795_v29, %v795_v29 }
 0x10d   : > { %811 = vrot.lane.b32.xlu1 %v803_v28, %s1224_s12 }
 0x10e   : > { %809 = vrot.lane.b32.xlu0 %v802_v30, %s1224_s12  ;;  %807 = vrot.lane.b32.xlu2 %v801_v32, %s1224_s12  ;;  %v996_v30 = vld [vmem:[%s1494_s1 + $0x1c] sm:$0xf]  ;;  %s1020_s12 = sshll.u32 %s1193_s18, 2 }
 0x10f   : > { %s892_s13 = sadd.s32 %s1020_s12, %s1019_s11 }
 0x110   : > { %s1021_s14 = sshll.u32 %s892_s13, 2  ;;  %s1135_s13 = scalar_lea.hbm %s1497_s4, 64 }
 0x111   : > { %s894_s23 = scalar_lea.hbm %s1497_s4, %s1021_s14 }
 0x112   : > { %s898_s27 = sshll.u32 %s894_s23, 4  ;;  %s899_s27 = int_to_ptr.hbm [resolvable:$true] %s898_s27 }
 0x113   : > { %s1129_s8 = sshra.s32 %s899_s27, 4  ;;  %s1130_s8 = int_to_ptr.hbm [resolvable:$true] %s1129_s8 }
 0x114   : > { %s1131_s10 = scalar_lea.hbm %s1130_s8, 8  ;;  %p1136_p5 = scmp.lt.s32.totalorder %s1130_s8, %s1497_s4 }
 0x115   : > { %p1132_p1 = scmp.ne.s32.totalorder %s1130_s8, %s1131_s10  ;;  %p1137_p6 = scmp.lt.s32.totalorder %s1135_s13, %s1131_s10 }
 0x116   : > { %855 = vperm.xlu2 %1113, %v251_v5  }
 0x117   : > { %p1133_p2 = pnand %p1132_p1, %p1303_p3  ;;  %p1138_p7 = por %p1137_p6, %p1136_p5 }
 0x119   : > { %p1134_p4 = pneg %p1133_p2 }
 0x11b   : > { %p1139_p9 = pnand %p1138_p7, %p1134_p4 }
 0x135   : > { %v414_v16 = vpop.permute.xlu2 %413 }
 0x13d   : > { %v486_v47 = vpop.permute.xlu2 %485 }
 0x145   : > { %v539_v57 = vpop.permute.xlu2 %538 }
 0x14b   : > { %v418_v43 = vpop.permute.xlu1 %417 }
 0x14c   : > { %v416_v44 = vpop.permute.xlu0 %415 }
 0x14d   : > { %v420_v45 = vsel %vm419_vm9, %v414_v16, %v416_v44  ;;  %v421_v46 = vsel %vm419_vm9, %v416_v44, %v418_v43 }
 0x14e   : > { %v426_v48 = vsel %vm302_vm7, %v420_v45, 0  ;;  %v429_v49 = vsel %vm302_vm7, %v421_v46, 0 }
 0x14f   : > { %438 = vmatpush.bf16.msrb.mxu0 %v426_v48  ;;  %451 = vmatpush.bf16.msrb.mxu1 %v429_v49  ;;  %v611_v2 = vpop.permute.xlu2 %610 }
 0x152   : > { %1002 = vmatmul.msk.bf16.vlgmr.msrb.gmra.mxu0 %vm298_vm8, %v991_v50  ;;  %1003 = vmatmul.msk.bf16.vlgmr.msrb.gmra.mxu1 %vm298_vm8, %v991_v50 }
 0x153   : > { %v490_v51 = vpop.permute.xlu1 %489 }
 0x155   : > { %v488_v52 = vpop.permute.xlu0 %487 }
 0x156   : > { %v492_v53 = vsel %vm491_vm10, %v486_v47, %v488_v52  ;;  %v493_v54 = vsel %vm491_vm10, %v488_v52, %v490_v51 }
 0x157   : > { %v498_v55 = vsel %vm302_vm7, %v492_v53, 0  ;;  %v501_v56 = vsel %vm302_vm7, %v493_v54, 0  ;;  %v683_v14 = vpop.permute.xlu2 %682 }
 0x158   : > { %510 = vmatpush.bf16.msrb.mxu2 %v498_v55  ;;  %523 = vmatpush.bf16.msrb.mxu3 %v501_v56 }
 0x15b   : > { %1004 = vmatmul.msk.bf16.vlgmr.msrb.gmra.mxu2 %vm298_vm8, %v992_v58  ;;  %1005 = vmatmul.msk.bf16.vlgmr.msrb.gmra.mxu3 %vm298_vm8, %v992_v58  ;;  %v543_v59 = vpop.permute.xlu1 %542 }
 0x15d   : > { %v541_v60 = vpop.permute.xlu0 %540 }
 0x15e   : > { %v545_v61 = vsel %vm544_vm11, %v539_v57, %v541_v60  ;;  %v546_v62 = vsel %vm544_vm11, %v541_v60, %v543_v59 }
 0x15f   : > { %v551_v63 = vsel %vm302_vm7, %v545_v61, 0  ;;  %v554_v0 = vsel %vm302_vm7, %v546_v62, 0  ;;  %v736_v25 = vpop.permute.xlu2 %735  ;;  %v353_v42 = vpop.f32.mrf.mxu2 }
 0x160   : > { %563 = vmatpush.bf16.msra.mxu0 %v551_v63  ;;  %576 = vmatpush.bf16.msra.mxu1 %v554_v0  ;;  %v366_v15 = vpop.f32.mrf.mxu3 }
 0x163   : > { %1006 = vmatmul.msk.bf16.vlgmr.msra.gmra.mxu0 %vm298_vm8, %v993_v1  ;;  %1007 = vmatmul.msk.bf16.vlgmr.msra.gmra.mxu1 %vm298_vm8, %v993_v1 }
 0x165   : > { %v615_v3 = vpop.permute.xlu1 %614 }
 0x166   : > { %v613_v4 = vpop.permute.xlu0 %612 }
 0x167   : > { %v617_v7 = vsel %vm616_vm12, %v611_v2, %v613_v4  ;;  %v618_v8 = vsel %vm616_vm12, %v613_v4, %v615_v3  ;;  %v355_v44 = vpop.f32.mrf.mxu2 }
 0x168   : > { %v623_v10 = vsel %vm302_vm7, %v617_v7, 0  ;;  %v626_v12 = vsel %vm302_vm7, %v618_v8, 0  ;;  %v808_v11 = vpop.permute.xlu2 %807  ;;  %v368_v45 = vpop.f32.mrf.mxu3 }
 0x169   : > { %635 = vmatpush.bf16.msra.mxu2 %v623_v10  ;;  %648 = vmatpush.bf16.msra.mxu3 %v626_v12 }
 0x16a   : > { %v318_v38 = vpop.f32.mrf.mxu0 }
 0x16b   : > { %v354_v16 = vadd.f32 %v353_v42, %v318_v38 }
 0x16c   : > { %1008 = vmatmul.msk.bf16.vlgmr.msra.gmra.mxu2 %vm298_vm8, %v994_v13  ;;  %1009 = vmatmul.msk.bf16.vlgmr.msra.gmra.mxu3 %vm298_vm8, %v994_v13  ;;  %v331_v39 = vpop.f32.mrf.mxu1 }
 0x16d   : > { %v687_v17 = vpop.permute.xlu1 %686  ;;  %v367_v43 = vadd.f32 %v366_v15, %v331_v39  ;;  %v1226_v39 = vmov 0.0  }
 0x16f   : > { %v685_v18 = vpop.permute.xlu0 %684 }
 0x170   : > { %v689_v19 = vsel %vm688_vm13, %v683_v14, %v685_v18  ;;  %v690_v20 = vsel %vm688_vm13, %v685_v18, %v687_v17 }
 0x171   : > { %v695_v21 = vsel %vm302_vm7, %v689_v19, 0  ;;  %v698_v22 = vsel %vm302_vm7, %v690_v20, 0  ;;  %v856_v20 = vpop.permute.xlu2 %855 }
 0x172   : > { %707 = vmatpush.bf16.msrb.mxu0 %v695_v21  ;;  %720 = vmatpush.bf16.msrb.mxu1 %v698_v22  ;;  %v320_v40 = vpop.f32.mrf.mxu0 }
 0x174   : > { %v333_v41 = vpop.f32.mrf.mxu1 }
 0x175   : > { %1010 = vmatmul.msk.bf16.vlgmr.msrb.gmra.mxu0 %vm298_vm8, %v995_v23  ;;  %1011 = vmatmul.msk.bf16.vlgmr.msrb.gmra.mxu1 %vm298_vm8, %v995_v23  ;;  %v740_v24 = vpop.permute.xlu1 %739 }
 0x177   : > { %v738_v26 = vpop.permute.xlu0 %737 }
 0x178   : > { %v742_v27 = vsel %vm741_vm14, %v736_v25, %v738_v26  ;;  %v743_v28 = vsel %vm741_vm14, %v738_v26, %v740_v24  ;;  %v860_v25 = vld [vmem:[#allocation2] sm:$0xff]  ;;  %v861_v26 = vld [vmem:[#allocation2 + $0x8] sm:$0xff] }
 0x179   : > { %v748_v6 = vsel %vm302_vm7, %v742_v27, 0  ;;  %v751_v29 = vsel %vm302_vm7, %v743_v28, 0 }
 0x17a   : > { %760 = vmatpush.bf16.msrb.mxu2 %v748_v6  ;;  %773 = vmatpush.bf16.msrb.mxu3 %v751_v29 }
 0x17d   : > { %1012 = vmatmul.msk.bf16.vlgmr.msrb.gmra.mxu2 %vm298_vm8, %v996_v30  ;;  %1013 = vmatmul.msk.bf16.vlgmr.msrb.gmra.mxu3 %vm298_vm8, %v996_v30 }
 0x17f   : > { %v812_v32 = vpop.permute.xlu1 %811 }
 0x180   : > { %v810_v31 = vpop.permute.xlu0 %809 }
 0x181   : > { %v814_v33 = vsel %vm813_vm15, %v808_v11, %v810_v31  ;;  %v815_v34 = vsel %vm813_vm15, %v810_v31, %v812_v32 }
 0x182   : > { %v820_v35 = vsel %vm302_vm7, %v814_v33, 0  ;;  %v823_v36 = vsel %vm302_vm7, %v815_v34, 0 }
 0x183   : > { %832 = vmatpush.bf16.msra.mxu0 %v820_v35  ;;  %845 = vmatpush.bf16.msra.mxu1 %v823_v36 }
 0x186   : > { %1014 = vmatmul.msk.bf16.vlgmr.msra.gmra.mxu0 %vm298_vm8, %v997_v37  ;;  %1015 = vmatmul.msk.bf16.vlgmr.msra.gmra.mxu1 %vm298_vm8, %v997_v37 }
 0x1cf   : > { %v440_v46 = vpop.f32.mrf.mxu0  ;;  %v453_v47 = vpop.f32.mrf.mxu1 }
 0x1d0   : > { %v457_v62 = vadd.f32 %v440_v46, %v354_v16  ;;  %v458_v63 = vadd.f32 %v453_v47, %v367_v43 }
 0x1d7   : > { %v442_v48 = vpop.f32.mrf.mxu0  ;;  %v455_v49 = vpop.f32.mrf.mxu1 }
 0x1de   : > { %v512_v50 = vpop.f32.mrf.mxu2  ;;  %v525_v51 = vpop.f32.mrf.mxu3 }
 0x1df   : > { %v529_v0 = vadd.f32 %v512_v50, %v457_v62  ;;  %v530_v1 = vadd.f32 %v525_v51, %v458_v63 }
 0x1e0   : > { %v565_v52 = vpop.f32.mrf.mxu0  ;;  %v578_v53 = vpop.f32.mrf.mxu1 }
 0x1e1   : > { %v582_v4 = vadd.f32 %v565_v52, %v529_v0  ;;  %v583_v5 = vadd.f32 %v578_v53, %v530_v1 }
 0x1e6   : > { %v514_v54 = vpop.f32.mrf.mxu2  ;;  %v527_v55 = vpop.f32.mrf.mxu3 }
 0x1e8   : > { %v567_v56 = vpop.f32.mrf.mxu0  ;;  %v580_v57 = vpop.f32.mrf.mxu1 }
 0x1ef   : > { %v637_v58 = vpop.f32.mrf.mxu2  ;;  %v650_v59 = vpop.f32.mrf.mxu3 }
 0x1f0   : > { %v654_v9 = vadd.f32 %v637_v58, %v582_v4  ;;  %v655_v10 = vadd.f32 %v650_v59, %v583_v5 }
 0x1f2   : > { %v709_v60 = vpop.f32.mrf.mxu0  ;;  %v722_v61 = vpop.f32.mrf.mxu1 }
 0x1f3   : > { %v726_v12 = vadd.f32 %v709_v60, %v654_v9  ;;  %v727_v13 = vadd.f32 %v722_v61, %v655_v10 }
 0x1f7   : > { %v639_v2 = vpop.f32.mrf.mxu2  ;;  %v652_v3 = vpop.f32.mrf.mxu3 }
 0x1fa   : > { %v711_v7 = vpop.f32.mrf.mxu0  ;;  %v724_v8 = vpop.f32.mrf.mxu1 }
 0x200   : > { %v762_v14 = vpop.f32.mrf.mxu2  ;;  %v775_v17 = vpop.f32.mrf.mxu3 }
 0x201   : > { %v779_v18 = vadd.f32 %v762_v14, %v726_v12  ;;  %v780_v19 = vadd.f32 %v775_v17, %v727_v13 }
 0x203   : > { %v834_v21 = vpop.f32.mrf.mxu0  ;;  %v847_v22 = vpop.f32.mrf.mxu1 }
 0x204   : > { %v851_v23 = vadd.f32 %v834_v21, %v779_v18  ;;  %v852_v24 = vadd.f32 %v847_v22, %v780_v19 }
 0x206   : > { %v858_v27 = vadd.f32 %v856_v20, %v851_v23  ;;  %v859_v28 = vadd.f32 %v856_v20, %v852_v24 }
 0x208   : > { %v862_v6 = vsub.f32 %v858_v27, %v860_v25  ;;  %v863_v29 = vsub.f32 %v859_v28, %v861_v26  ;;  %v764_v30 = vpop.f32.mrf.mxu2  ;;  %v777_v32 = vpop.f32.mrf.mxu3 }
 0x20a   : > { %v864_v11 = vmul.f32 0.5, %v862_v6  ;;  %v865_v31 = vmul.f32 0.5, %v863_v29 }
 0x20b   : > { %v836_v33 = vpop.f32.mrf.mxu0  ;;  %v849_v34 = vpop.f32.mrf.mxu1 }
 0x20c   : > { %v866_v35 = vadd.f32 %v864_v11, %v860_v25  ;;  %v867_v36 = vadd.f32 %v865_v31, %v861_v26 }
 0x20e   : > { %vm868_vm0 = vcmp.ge.f32.partialorder %v866_v35, 1.0  ;;  %vm869_vm1 = vcmp.ge.f32.partialorder %v867_v36, 1.0 }
 0x20f   : > { %v870_v37 = vsel %vm868_vm0, 0.0, %v866_v35  ;;  %v871_v38 = vsel %vm869_vm1, 0.0, %v867_v36  ;;  %v1016_v40 = vsel %vm868_vm0, 1.0, %v1226_v39  ;;  %v1017_v41 = vsel %vm869_vm1, 1.0, %v1226_v39 }
 0x210   : > { %872 = vst [vmem:[#allocation2] sm:$0xff] %v870_v37  ;;  %v878_v42 = vpack.c.bf16 %v1017_v41, %v1016_v40 }
 0x211   : > { %873 = vst [vmem:[#allocation2 + $0x8] sm:$0xff] %v871_v38 }
 0x212   : > { %879 = vst [vmem:[%s214_s5] sm:$0xff] %v878_v42 }
 0x213   : > { %1142 = shalt.err (!%p1139_p9)
}
 0x214   : > { %1026 = dma.vmem_to_hbm [thread:$0]  (%p1303_p3), %s897_s24, 128, %s899_s27, %s881_s6  }
 0x215 PF: > { %p1032_p10 = scmp.ge.s32.totalorder %s1209_s22, 2  ;;  %s910_s9 = sand.u32 1, %s1181_s15  }
 0x216   : > { %s911_s5 = scalar_lea.sflag [#allocation4], %s910_s9 }
 0x217   : > { %p1029_p11 = pnand %p1032_p10, %p1312_p8 }
 0x219   : > { %p1030_p12 = pneg %p1029_p11 }
 0x21b   : > { %1176 = dma.done.wait (%p1030_p12), %s911_s5, 128  }
 0x21c   : > { %1178 = vsyncadd (%p1030_p12), %s911_s5, 4294967168  ;;  %s17_s22 = sadd.s32 1, %s1209_s22   ;;  %s1502_s15 = smov %s1185_s16 }
 0x21d   : > { %p14_p13 = scmp.ge.s32.totalorder %s17_s22, 10   ;;  %s1503_s16 = smov %s1189_s17 }
 0x21e   : > { %s1504_s17 = smov %s1321_s7  ;;  %s1505_s18 = smov %s1201_s20 }
 0x21f   : > { %s1506_s19 = smov %s1205_s21  ;;  %s1507_s20 = smov %s1510_s25 }
 0x220   : > { %s1508_s21 = smov %s1514_s26  ;;  %16 = sbr.rel (!%p14_p13) target bundleno = 5 (0x5), region = 89 }
 0x225   :  { %917 = vsyncpa [#allocation4], 1 }
 0x226   :  { %919 = vsyncpa [#allocation4 + $0x1], 1 }

</bundles_post_ra>
